<compile_context>
chip_gen: v5e
topology: v5e:2x2
jax: 0.10.0
libtpu: 0.0.40
codegen_flags: <defaults>
</compile_context>

<pallas_src>
import functools

import jax
import jax.numpy as jnp
from jax.experimental import pallas as pl
from jax.experimental.pallas import tpu as pltpu


def _round_up(a, b):
    return ((a + b - 1) // b) * b


def _mlp_kernel(x_ref, *rest):
    """rest = (*weight_refs, out_ref).

    All matmuls hit the MXU with f32 accumulation; ReLU runs on the VPU in
    f32 and is cast back to the compute dtype for the next MXU pass.
    """
    *w_refs, o_ref = rest
    h = x_ref[...]
    last = len(w_refs) - 1
    for li, w_ref in enumerate(w_refs):
        h = jnp.dot(h, w_ref[...], preferred_element_type=jnp.float32)
        if li != last:
            h = jnp.maximum(h, 0.0).astype(w_ref.dtype)
    o_ref[...] = h.astype(o_ref.dtype)


@functools.partial(jax.jit, static_argnames=("batch_tile", "compute_dtype"))
def simplenet_forward(x, weights, batch_tile=1024, compute_dtype=jnp.bfloat16):
    """Forward pass of SimpleNet_den_mnist.

    x:       (N, 1, 28, 28) or (N, 784) float array (NCHW like torch MNIST).
    weights: tuple of (in_features, out_features) arrays (transpose of torch
             nn.Linear layout), one per layer; ReLU after all but the last.
    """
    x2 = x.reshape(-1, 28 * 28)                       # same as torch x.view(-1, 784)
    n, d_in = x2.shape

    itemsize = jnp.dtype(compute_dtype).itemsize
    sub = 8 * (4 // itemsize)                         # sublane packing (16 for bf16)

    # Batch tile: as large as requested, shrunk for small batches, sublane
    # aligned.  Big tiles amortize the ~0.35us/grid-step cost and fill the MXU.
    tile = max(sub, min(int(batch_tile), _round_up(n, sub)))
    tile = _round_up(tile, sub)
    n_pad = _round_up(n, tile)
    if n_pad != n:
        x2 = jnp.pad(x2, ((0, n_pad - n), (0, 0)))    # zero rows -> zero logits, sliced off

    d_out = weights[-1].shape[1]
    d_out_pad = _round_up(d_out, 128)                 # lane-dense output store

    # Cast streamed operands to the compute dtype (bf16 default: native MXU
    # input width, halves HBM traffic on x).  Accumulation stays f32.
    x2 = x2.astype(compute_dtype)
    ws = [w.astype(compute_dtype) for w in weights]
    if d_out_pad != d_out:
        ws[-1] = jnp.pad(ws[-1], ((0, 0), (0, d_out_pad - d_out)))

    grid = (n_pad // tile,)

    in_specs = [pl.BlockSpec((tile, d_in), lambda i: (i, 0))]
    for w in ws:
        # Full-array weight blocks with a constant index_map -> resident in VMEM.
        in_specs.append(pl.BlockSpec(w.shape, lambda i: (0, 0)))
    out_specs = pl.BlockSpec((tile, d_out_pad), lambda i: (i, 0))

    # Advisory cost estimate for the XLA scheduler.
    dims = [d_in] + [w.shape[1] for w in ws]
    flops = 2 * n_pad * sum(a * b for a, b in zip(dims[:-1], dims[1:]))
    bytes_accessed = (x2.size * itemsize
                      + sum(w.size * itemsize for w in ws)
                      + n_pad * d_out_pad * 4)
    cost = pl.CostEstimate(flops=int(flops), transcendentals=0,
                           bytes_accessed=int(bytes_accessed))

    # Scoped-VMEM headroom: double-buffered x/out tiles + weights, with margin.
    # Kept below v7x's 64 MiB physical VMEM; covers v5e's 16 MiB scoped default
    # if a larger batch_tile is requested.
    vmem_bytes = 2 * tile * (d_in * itemsize + d_out_pad * 4)
    vmem_bytes += 2 * sum(w.size * itemsize for w in ws)
    vmem_bytes = int(vmem_bytes * 1.5) + (2 << 20)
    vmem_limit = min(max(vmem_bytes, 32 * 1024 * 1024), 48 * 1024 * 1024)

    out = pl.pallas_call(
        _mlp_kernel,
        out_shape=jax.ShapeDtypeStruct((n_pad, d_out_pad), jnp.float32),
        grid_spec=pltpu.PrefetchScalarGridSpec(
            num_scalar_prefetch=0,
            grid=grid,
            in_specs=in_specs,
            out_specs=out_specs,
        ),
        compiler_params=pltpu.CompilerParams(
            dimension_semantics=("parallel",),        # shard batch tiles across TCs
            vmem_limit_bytes=int(vmem_limit),
        ),
        cost_estimate=cost,
    )(x2, *ws)

    return out[:n, :d_out]


def init_weights(key, structure=(128, 64, 128, 64, 128),
                 input_size=28 * 28, output_size=10):
    """nn.Linear default init U(-1/sqrt(fan_in), 1/sqrt(fan_in)); stored (in, out)."""
    dims = [input_size] + list(structure) + [output_size]
    keys = jax.random.split(key, len(dims) - 1)
    ws = []
    for k, fan_in, fan_out in zip(keys, dims[:-1], dims[1:]):
        bound = 1.0 / float(fan_in) ** 0.5
        ws.append(jax.random.uniform(k, (fan_in, fan_out), jnp.float32,
                                     minval=-bound, maxval=bound))
    return tuple(ws)


def _reference_forward(x, weights, compute_dtype=jnp.float32):
    h = x.reshape(-1, 28 * 28).astype(compute_dtype)
    for i, w in enumerate(weights):
        h = jnp.dot(h, w.astype(compute_dtype), preferred_element_type=jnp.float32)
        if i != len(weights) - 1:
            h = jnp.maximum(h, 0.0).astype(compute_dtype)
    return h


if __name__ == "__main__":
    key = jax.random.PRNGKey(0)
    k_w, k_x = jax.random.split(key)

    weights = init_weights(k_w)
    # NCHW input like torch MNIST: (batch=2, channels=1, 28, 28)
    x = jax.random.normal(k_x, (2, 1, 28, 28), dtype=jnp.float32)

    out = simplenet_forward(x, weights)
    out = jax.block_until_ready(out)
    assert out.shape == (2, 10), out.shape

    # Reference with the same bf16 casts as the kernel -> tight tolerance.
    ref_bf16 = _reference_forward(x, weights, jnp.bfloat16)
    assert jnp.allclose(out, ref_bf16, atol=5e-3, rtol=5e-3), "mismatch vs bf16 reference"

    # Pure-f32 reference (original torch semantics) -> loose tolerance for bf16 inputs.
    ref_f32 = _reference_forward(x, weights, jnp.float32)
    assert jnp.allclose(out, ref_f32, atol=5e-2, rtol=5e-2), "mismatch vs f32 reference"

    print("KERNEL_OK")
</pallas_src>

<mosaic_0001>
module attributes {stable_mosaic.version = 11 : i64} {
  func.func @_mlp_kernel(%arg0: i32, %arg1: memref<16x784xbf16, #tpu.memory_space<vmem>>, %arg2: memref<784x128xbf16, #tpu.memory_space<vmem>>, %arg3: memref<128x64xbf16, #tpu.memory_space<vmem>>, %arg4: memref<64x128xbf16, #tpu.memory_space<vmem>>, %arg5: memref<128x64xbf16, #tpu.memory_space<vmem>>, %arg6: memref<64x128xbf16, #tpu.memory_space<vmem>>, %arg7: memref<128x128xbf16, #tpu.memory_space<vmem>>, %arg8: memref<16x128xf32, #tpu.memory_space<vmem>>) attributes {dimension_semantics = [#tpu.dimension_semantics<parallel>], iteration_bounds = array<i64: 1>, scalar_prefetch = 0 : i64, scratch_operands = 0 : i64, tpu.core_type = #tpu.core_type<tc>, window_params = [{transform_indices = @transform_0, window_bounds = array<i64: 16, 784>}, {pipeline_mode = #tpu.pipeline_mode<synchronous>, transform_indices = @transform_1, window_bounds = array<i64: 784, 128>}, {pipeline_mode = #tpu.pipeline_mode<synchronous>, transform_indices = @transform_2, window_bounds = array<i64: 128, 64>}, {pipeline_mode = #tpu.pipeline_mode<synchronous>, transform_indices = @transform_3, window_bounds = array<i64: 64, 128>}, {pipeline_mode = #tpu.pipeline_mode<synchronous>, transform_indices = @transform_4, window_bounds = array<i64: 128, 64>}, {pipeline_mode = #tpu.pipeline_mode<synchronous>, transform_indices = @transform_5, window_bounds = array<i64: 64, 128>}, {pipeline_mode = #tpu.pipeline_mode<synchronous>, transform_indices = @transform_6, window_bounds = array<i64: 128, 128>}, {transform_indices = @transform_7, window_bounds = array<i64: 16, 128>}]} {
    %c0 = arith.constant 0 : index
    %c0_0 = arith.constant 0 : index
    %0 = vector.load %arg1[%c0, %c0_0] : memref<16x784xbf16, #tpu.memory_space<vmem>>, vector<16x784xbf16>
    %c0_1 = arith.constant 0 : index
    %c0_2 = arith.constant 0 : index
    %1 = vector.load %arg2[%c0_1, %c0_2] : memref<784x128xbf16, #tpu.memory_space<vmem>>, vector<784x128xbf16>
    %cst = arith.constant dense<0.000000e+00> : vector<16x128xf32>
    %2 = tpu.matmul %0, %1, %cst {dimension_numbers = #tpu.dot_dimension_numbers<[1], [0], [0], [1], [0, 0, 1, 1], [], []>} : vector<16x784xbf16>, vector<784x128xbf16>, vector<16x128xf32> -> vector<16x128xf32>
    %cst_3 = arith.constant 0.000000e+00 : f32
    %3 = vector.broadcast %cst_3 : f32 to vector<16x128xf32>
    %4 = arith.maximumf %2, %3 : vector<16x128xf32>
    %5 = arith.truncf %4 : vector<16x128xf32> to vector<16x128xbf16>
    %c0_4 = arith.constant 0 : index
    %c0_5 = arith.constant 0 : index
    %6 = vector.load %arg3[%c0_4, %c0_5] : memref<128x64xbf16, #tpu.memory_space<vmem>>, vector<128x64xbf16>
    %cst_6 = arith.constant dense<0.000000e+00> : vector<16x64xf32>
    %7 = tpu.matmul %5, %6, %cst_6 {dimension_numbers = #tpu.dot_dimension_numbers<[1], [0], [0], [1], [0, 0, 1, 1], [], []>} : vector<16x128xbf16>, vector<128x64xbf16>, vector<16x64xf32> -> vector<16x64xf32>
    %cst_7 = arith.constant 0.000000e+00 : f32
    %8 = vector.broadcast %cst_7 : f32 to vector<16x64xf32>
    %9 = arith.maximumf %7, %8 : vector<16x64xf32>
    %10 = arith.truncf %9 : vector<16x64xf32> to vector<16x64xbf16>
    %c0_8 = arith.constant 0 : index
    %c0_9 = arith.constant 0 : index
    %11 = vector.load %arg4[%c0_8, %c0_9] : memref<64x128xbf16, #tpu.memory_space<vmem>>, vector<64x128xbf16>
    %cst_10 = arith.constant dense<0.000000e+00> : vector<16x128xf32>
    %12 = tpu.matmul %10, %11, %cst_10 {dimension_numbers = #tpu.dot_dimension_numbers<[1], [0], [0], [1], [0, 0, 1, 1], [], []>} : vector<16x64xbf16>, vector<64x128xbf16>, vector<16x128xf32> -> vector<16x128xf32>
    %cst_11 = arith.constant 0.000000e+00 : f32
    %13 = vector.broadcast %cst_11 : f32 to vector<16x128xf32>
    %14 = arith.maximumf %12, %13 : vector<16x128xf32>
    %15 = arith.truncf %14 : vector<16x128xf32> to vector<16x128xbf16>
    %c0_12 = arith.constant 0 : index
    %c0_13 = arith.constant 0 : index
    %16 = vector.load %arg5[%c0_12, %c0_13] : memref<128x64xbf16, #tpu.memory_space<vmem>>, vector<128x64xbf16>
    %cst_14 = arith.constant dense<0.000000e+00> : vector<16x64xf32>
    %17 = tpu.matmul %15, %16, %cst_14 {dimension_numbers = #tpu.dot_dimension_numbers<[1], [0], [0], [1], [0, 0, 1, 1], [], []>} : vector<16x128xbf16>, vector<128x64xbf16>, vector<16x64xf32> -> vector<16x64xf32>
    %cst_15 = arith.constant 0.000000e+00 : f32
    %18 = vector.broadcast %cst_15 : f32 to vector<16x64xf32>
    %19 = arith.maximumf %17, %18 : vector<16x64xf32>
    %20 = arith.truncf %19 : vector<16x64xf32> to vector<16x64xbf16>
    %c0_16 = arith.constant 0 : index
    %c0_17 = arith.constant 0 : index
    %21 = vector.load %arg6[%c0_16, %c0_17] : memref<64x128xbf16, #tpu.memory_space<vmem>>, vector<64x128xbf16>
    %cst_18 = arith.constant dense<0.000000e+00> : vector<16x128xf32>
    %22 = tpu.matmul %20, %21, %cst_18 {dimension_numbers = #tpu.dot_dimension_numbers<[1], [0], [0], [1], [0, 0, 1, 1], [], []>} : vector<16x64xbf16>, vector<64x128xbf16>, vector<16x128xf32> -> vector<16x128xf32>
    %cst_19 = arith.constant 0.000000e+00 : f32
    %23 = vector.broadcast %cst_19 : f32 to vector<16x128xf32>
    %24 = arith.maximumf %22, %23 : vector<16x128xf32>
    %25 = arith.truncf %24 : vector<16x128xf32> to vector<16x128xbf16>
    %c0_20 = arith.constant 0 : index
    %c0_21 = arith.constant 0 : index
    %26 = vector.load %arg7[%c0_20, %c0_21] : memref<128x128xbf16, #tpu.memory_space<vmem>>, vector<128x128xbf16>
    %cst_22 = arith.constant dense<0.000000e+00> : vector<16x128xf32>
    %27 = tpu.matmul %25, %26, %cst_22 {dimension_numbers = #tpu.dot_dimension_numbers<[1], [0], [0], [1], [0, 0, 1, 1], [], []>} : vector<16x128xbf16>, vector<128x128xbf16>, vector<16x128xf32> -> vector<16x128xf32>
    %c0_23 = arith.constant 0 : index
    %c0_24 = arith.constant 0 : index
    %28 = vector.load %arg8[%c0_23, %c0_24] : memref<16x128xf32, #tpu.memory_space<vmem>>, vector<16x128xf32>
    tpu.vector_store %arg8[%c0_23, %c0_24], %27 {strides = array<i32>} : memref<16x128xf32, #tpu.memory_space<vmem>>, vector<16x128xf32>,
    return
  }
  func.func @transform_0(%arg0: i32) -> (i32, i32) {
    %c0_i32 = arith.constant 0 : i32
    %c0_i32_0 = arith.constant 0 : i32
    return %arg0, %c0_i32 : i32, i32
  }
  func.func @transform_1(%arg0: i32) -> (i32, i32) {
    %c0_i32 = arith.constant 0 : i32
    %c0_i32_0 = arith.constant 0 : i32
    %c0_i32_1 = arith.constant 0 : i32
    return %c0_i32, %c0_i32_0 : i32, i32
  }
  func.func @transform_2(%arg0: i32) -> (i32, i32) {
    %c0_i32 = arith.constant 0 : i32
    %c0_i32_0 = arith.constant 0 : i32
    %c0_i32_1 = arith.constant 0 : i32
    return %c0_i32, %c0_i32_0 : i32, i32
  }
  func.func @transform_3(%arg0: i32) -> (i32, i32) {
    %c0_i32 = arith.constant 0 : i32
    %c0_i32_0 = arith.constant 0 : i32
    %c0_i32_1 = arith.constant 0 : i32
    return %c0_i32, %c0_i32_0 : i32, i32
  }
  func.func @transform_4(%arg0: i32) -> (i32, i32) {
    %c0_i32 = arith.constant 0 : i32
    %c0_i32_0 = arith.constant 0 : i32
    %c0_i32_1 = arith.constant 0 : i32
    return %c0_i32, %c0_i32_0 : i32, i32
  }
  func.func @transform_5(%arg0: i32) -> (i32, i32) {
    %c0_i32 = arith.constant 0 : i32
    %c0_i32_0 = arith.constant 0 : i32
    %c0_i32_1 = arith.constant 0 : i32
    return %c0_i32, %c0_i32_0 : i32, i32
  }
  func.func @transform_6(%arg0: i32) -> (i32, i32) {
    %c0_i32 = arith.constant 0 : i32
    %c0_i32_0 = arith.constant 0 : i32
    %c0_i32_1 = arith.constant 0 : i32
    return %c0_i32, %c0_i32_0 : i32, i32
  }
  func.func @transform_7(%arg0: i32) -> (i32, i32) {
    %c0_i32 = arith.constant 0 : i32
    %c0_i32_0 = arith.constant 0 : i32
    return %arg0, %c0_i32 : i32, i32
  }
}

</mosaic_0001>

<bundles_post_ra>
// kernel: simplenet_forward.1
= control target key start
LH: loop header
LB: loop body
LE: loop exit
PB: predicated region body
PF: predicated region fallthrough
CT: control target
= control target key end

     0   :  { %vm462_vm0 = vcmask 130048   ;;  %vm680_vm1 = vcmask 523264   ;;  %s1694_s1 = inlined_call_operand.vmem [shape: bf16[784,128], index: 1, kind: input, shape index: {}]   ;;  %s1695_s0 = inlined_call_operand.vmem [shape: bf16[16,784], index: 0, kind: input, shape index: {}]   ;;  %s1696_s2 = inlined_call_operand.vmem [shape: bf16[128,64], index: 2, kind: input, shape index: {}]   ;;  %s1697_s3 = inlined_call_operand.vmem [shape: bf16[64,128], index: 3, kind: input, shape index: {}]   ;;  %s1698_s4 = inlined_call_operand.vmem [shape: bf16[128,64], index: 4, kind: input, shape index: {}]   ;;  %s1699_s5 = inlined_call_operand.vmem [shape: bf16[64,128], index: 5, kind: input, shape index: {}]   ;;  %s1700_s6 = inlined_call_operand.vmem [shape: bf16[128,128], index: 6, kind: input, shape index: {}]   ;;  %s1701_s7 = inlined_call_operand.vmem [shape: f32[16,128], index: 7, kind: output, shape index: {}]  }
   0x1   :  { %v1287_v0 = vld [vmem:[%s1694_s1 + $0x38] sm:$0xff]  ;;  %v1286_v4 = vld [vmem:[%s1694_s1 + $0x30] sm:$0xff]  ;;  %v1285_v8 = vld [vmem:[%s1694_s1 + $0x28] sm:$0xff] }
   0x2   :  { %v1295_v1 = vld [vmem:[%s1694_s1 + $0x78] sm:$0xff]  ;;  %466 = vmatpush.bf16.msra.mxu0 %v1287_v0  ;;  %v1294_v5 = vld [vmem:[%s1694_s1 + $0x70] sm:$0xff]  ;;  %v1293_v9 = vld [vmem:[%s1694_s1 + $0x68] sm:$0xff] }
   0x3   :  { %v1303_v2 = vld [vmem:[%s1694_s1 + $0xb8] sm:$0xff]  ;;  %480 = vmatpush.bf16.msra.mxu1 %v1295_v1  ;;  %v1302_v6 = vld [vmem:[%s1694_s1 + $0xb0] sm:$0xff]  ;;  %v1301_v10 = vld [vmem:[%s1694_s1 + $0xa8] sm:$0xff] }
   0x4   :  { %v1311_v3 = vld [vmem:[%s1694_s1 + $0xf8] sm:$0xff]  ;;  %494 = vmatpush.bf16.msra.mxu2 %v1303_v2  ;;  %v1310_v7 = vld [vmem:[%s1694_s1 + $0xf0] sm:$0xff]  ;;  %v1309_v11 = vld [vmem:[%s1694_s1 + $0xe8] sm:$0xff] }
   0x5   :  { %508 = vmatpush.bf16.msra.mxu3 %v1311_v3  ;;  %v1284_v12 = vld [vmem:[%s1694_s1 + $0x20] sm:$0xff]  ;;  %v1283_v16 = vld [vmem:[%s1694_s1 + $0x18] sm:$0xff]  ;;  %v1282_v20 = vld [vmem:[%s1694_s1 + $0x10] sm:$0xff] }
   0x6   :  { %467 = vmatpush.bf16.msra.mxu0 %v1286_v4  ;;  %v1292_v13 = vld [vmem:[%s1694_s1 + $0x60] sm:$0xff]  ;;  %v1291_v17 = vld [vmem:[%s1694_s1 + $0x58] sm:$0xff]  ;;  %v1290_v21 = vld [vmem:[%s1694_s1 + $0x50] sm:$0xff] }
   0x7   :  { %481 = vmatpush.bf16.msra.mxu1 %v1294_v5  ;;  %v1300_v14 = vld [vmem:[%s1694_s1 + $0xa0] sm:$0xff]  ;;  %v1299_v18 = vld [vmem:[%s1694_s1 + $0x98] sm:$0xff]  ;;  %v1298_v22 = vld [vmem:[%s1694_s1 + $0x90] sm:$0xff] }
   0x8   :  { %495 = vmatpush.bf16.msra.mxu2 %v1302_v6  ;;  %v1308_v15 = vld [vmem:[%s1694_s1 + $0xe0] sm:$0xff]  ;;  %v1307_v19 = vld [vmem:[%s1694_s1 + $0xd8] sm:$0xff]  ;;  %v1306_v23 = vld [vmem:[%s1694_s1 + $0xd0] sm:$0xff] }
   0x9   :  { %509 = vmatpush.bf16.msra.mxu3 %v1310_v7  ;;  %v1281_v24 = vld [vmem:[%s1694_s1 + $0x8] sm:$0xff]  ;;  %v1280_v28 = vld [vmem:[%s1694_s1] sm:$0xff]  ;;  %v1319_v31 = vld [vmem:[%s1694_s1 + $0x138] sm:$0xff] }
   0xa   :  { %468 = vmatpush.bf16.msra.mxu0 %v1285_v8  ;;  %v1289_v25 = vld [vmem:[%s1694_s1 + $0x48] sm:$0xff]  ;;  %v1288_v29 = vld [vmem:[%s1694_s1 + $0x40] sm:$0xff]  ;;  %v1276_v33 = vld [vmem:[%s1695_s0 + $0x18] sm:$0xf0] }
   0xb   :  { %482 = vmatpush.bf16.msra.mxu1 %v1293_v9  ;;  %v1297_v26 = vld [vmem:[%s1694_s1 + $0x88] sm:$0xff]  ;;  %v1296_v30 = vld [vmem:[%s1694_s1 + $0x80] sm:$0xff]  ;;  %v1327_v36 = vld [vmem:[%s1694_s1 + $0x178] sm:$0xff] }
   0xc   :  { %496 = vmatpush.bf16.msra.mxu2 %v1301_v10  ;;  %v1305_v27 = vld [vmem:[%s1694_s1 + $0xc8] sm:$0xff]  ;;  %v920_v32 = vld [vmem:[%s1695_s0] sm:$0xf]  ;;  %v1273_v34 = vld [vmem:[%s1695_s0 + $0x4] sm:$0xf] }
   0xd   :  { %510 = vmatpush.bf16.msra.mxu3 %v1309_v11  ;;  %v922_v35 = vld [vmem:[%s1695_s0 + $0x1c] sm:$0xf0]  ;;  %v928_v37 = vld [vmem:[%s1695_s0 + $0x8] sm:$0xf]  ;;  %v1277_v38 = vld [vmem:[%s1695_s0 + $0x20] sm:$0xf0]  ;;  %v921_v42 = vor.u32 %v1276_v33, %v920_v32 }
   0xe   :  { %469 = vmatpush.bf16.msra.mxu0 %v1284_v12  ;;  %v1304_v39 = vld [vmem:[%s1694_s1 + $0xc0] sm:$0xff]  ;;  %v1274_v40 = vld [vmem:[%s1695_s0 + $0xc] sm:$0xf]  ;;  %v930_v41 = vld [vmem:[%s1695_s0 + $0x24] sm:$0xf0]  ;;  %v925_v43 = vor.u32 %v1273_v34, %v922_v35  ;;  %v929_v44 = vor.u32 %v1277_v38, %v928_v37 }
   0xf   :  { %483 = vmatpush.bf16.msra.mxu1 %v1292_v13  ;;  %v1318_v45 = vld [vmem:[%s1694_s1 + $0x130] sm:$0xff]  ;;  %v933_v46 = vor.u32 %v1274_v40, %v930_v41  ;;  %v1328_v48 = vld [vmem:[%s1694_s1 + $0x180] sm:$0xff]  ;;  %v1317_v49 = vld [vmem:[%s1694_s1 + $0x128] sm:$0xff] }
  0x10   :  { %497 = vmatpush.bf16.msra.mxu2 %v1300_v14  ;;  %v1326_v47 = vld [vmem:[%s1694_s1 + $0x170] sm:$0xff]  ;;  %v1325_v50 = vld [vmem:[%s1694_s1 + $0x168] sm:$0xff]  ;;  %v1316_v51 = vld [vmem:[%s1694_s1 + $0x120] sm:$0xff] }
  0x11   :  { %511 = vmatpush.bf16.msra.mxu3 %v1308_v15  ;;  %v1324_v52 = vld [vmem:[%s1694_s1 + $0x160] sm:$0xff]  ;;  %v1315_v53 = vld [vmem:[%s1694_s1 + $0x118] sm:$0xff]  ;;  %v1279_v55 = vld [vmem:[%s1695_s0 + $0x30] sm:$0xf0] }
  0x12   :  { %470 = vmatpush.bf16.msra.mxu0 %v1283_v16  ;;  %v944_v54 = vld [vmem:[%s1695_s0 + $0x18] sm:$0xf]  ;;  %v1314_v58 = vld [vmem:[%s1694_s1 + $0x110] sm:$0xff]  ;;  %v1313_v60 = vld [vmem:[%s1694_s1 + $0x108] sm:$0xff] }
  0x13   :  { %484 = vmatpush.bf16.msra.mxu1 %v1291_v17  ;;  %v1323_v56 = vld [vmem:[%s1694_s1 + $0x158] sm:$0xff]  ;;  %v945_v57 = vor.u32 %v1279_v55, %v944_v54  ;;  %v1322_v59 = vld [vmem:[%s1694_s1 + $0x150] sm:$0xff]  ;;  %v1321_v61 = vld [vmem:[%s1694_s1 + $0x148] sm:$0xff] }
  0x14   :  { %498 = vmatpush.bf16.msra.mxu2 %v1299_v18  ;;  %v1312_v62 = vld [vmem:[%s1694_s1 + $0x100] sm:$0xff]  ;;  %v936_v63 = vld [vmem:[%s1695_s0 + $0x10] sm:$0xf]  ;;  %v1278_v0 = vld [vmem:[%s1695_s0 + $0x28] sm:$0xf0] }
  0x15   :  { %512 = vmatpush.bf16.msra.mxu3 %v1307_v19  ;;  %v1320_v1 = vld [vmem:[%s1694_s1 + $0x140] sm:$0xff]  ;;  %v1275_v2 = vld [vmem:[%s1695_s0 + $0x14] sm:$0xf]  ;;  %v938_v3 = vld [vmem:[%s1695_s0 + $0x2c] sm:$0xf0]  ;;  %v937_v4 = vor.u32 %v1278_v0, %v936_v63 }
  0x16   :  { %471 = vmatpush.bf16.msra.mxu0 %v1282_v20  ;;  %v941_v5 = vor.u32 %v1275_v2, %v938_v3  ;;  %v1336_v6 = vld [vmem:[%s1696_s2 + $0x38] sm:$0xff]  ;;  %v1335_v7 = vld [vmem:[%s1696_s2 + $0x30] sm:$0xff]  ;;  %v1334_v8 = vld [vmem:[%s1696_s2 + $0x28] sm:$0xff] }
  0x17   :  { %485 = vmatpush.bf16.msra.mxu1 %v1290_v21  ;;  %v1333_v9 = vld [vmem:[%s1696_s2 + $0x20] sm:$0xff]  ;;  %v1332_v10 = vld [vmem:[%s1696_s2 + $0x18] sm:$0xff]  ;;  %v1331_v11 = vld [vmem:[%s1696_s2 + $0x10] sm:$0xff] }
  0x18   :  { %499 = vmatpush.bf16.msra.mxu2 %v1298_v22  ;;  %v1330_v12 = vld [vmem:[%s1696_s2 + $0x8] sm:$0xff]  ;;  %v1329_v15 = vld [vmem:[%s1696_s2] sm:$0xff]  ;;  %v1340_v17 = vld [vmem:[%s1697_s3 + $0x18] sm:$0xff] }
  0x19   :  { %513 = vmatpush.bf16.msra.mxu3 %v1306_v23  ;;  %v1351_v2 = vld [vmem:[%s1699_s5 + $0x10] sm:$0xff]  ;;  %v1350_v3 = vld [vmem:[%s1699_s5 + $0x8] sm:$0xff] }
  0x1a   :  { %472 = vmatpush.bf16.msra.mxu0 %v1281_v24 }
  0x1b   :  { %486 = vmatpush.bf16.msra.mxu1 %v1289_v25 }
  0x1c   :  { %500 = vmatpush.bf16.msra.mxu2 %v1297_v26 }
  0x1d   :  { %514 = vmatpush.bf16.msra.mxu3 %v1305_v27 }
  0x1e   :  { %473 = vmatpush.bf16.msra.mxu0 %v1280_v28 }
  0x1f   :  { %487 = vmatpush.bf16.msra.mxu1 %v1288_v29 }
  0x20   :  { %501 = vmatpush.bf16.msra.mxu2 %v1296_v30 }
  0x21   :  { %515 = vmatpush.bf16.msra.mxu3 %v1304_v39  ;;  %474 = vmatmul.bf16.vlgmr.msra.gmra.mxu0 %v921_v42 }
  0x22   :  { %522 = vmatpush.bf16.msrb.mxu0 %v1319_v31  ;;  %488 = vmatmul.bf16.vlgmr.msra.gmra.mxu1 %v925_v43 }
  0x23   :  { %536 = vmatpush.bf16.msrb.mxu1 %v1327_v36  ;;  %502 = vmatmul.bf16.vlgmr.msra.gmra.mxu2 %v929_v44  ;;  %v1339_v44 = vld [vmem:[%s1697_s3 + $0x10] sm:$0xff] }
  0x24   :  { %516 = vmatmul.bf16.vlgmr.msra.gmra.mxu3 %v933_v46  ;;  %557 = vmatpush.bf16.msrb.mxu2 %v1328_v48  ;;  %v1337_v46 = vld [vmem:[%s1697_s3] sm:$0xff]  ;;  %v1347_v48 = vld [vmem:[%s1698_s4 + $0x30] sm:$0xff] }
  0x25   :  { %631 = vmatpush.bf16.msrb.mxu3 %v1336_v6  ;;  %v1359_v6 = vld [vmem:[%s1700_s6 + $0x30] sm:$0xff] }
  0x26   :  { %523 = vmatpush.bf16.msrb.mxu0 %v1318_v45  ;;  %v1338_v45 = vld [vmem:[%s1697_s3 + $0x8] sm:$0xff] }
  0x27   :  { %537 = vmatpush.bf16.msrb.mxu1 %v1326_v47  ;;  %v1348_v47 = vld [vmem:[%s1698_s4 + $0x38] sm:$0xff] }
  0x28   :  { %688 = vmatpush.bf16.msra.mxu2 %v1340_v17  ;;  %v1353_v17 = vld [vmem:[%s1700_s6] sm:$0xff] }
  0x29   :  { %632 = vmatpush.bf16.msrb.mxu3 %v1335_v7  ;;  %v1358_v7 = vld [vmem:[%s1700_s6 + $0x28] sm:$0xff] }
  0x2a   :  { %524 = vmatpush.bf16.msrb.mxu0 %v1317_v49  ;;  %v1346_v49 = vld [vmem:[%s1698_s4 + $0x28] sm:$0xff] }
  0x2b   :  { %538 = vmatpush.bf16.msrb.mxu1 %v1325_v50  ;;  %v1345_v50 = vld [vmem:[%s1698_s4 + $0x20] sm:$0xff] }
  0x2c   :  { %689 = vmatpush.bf16.msra.mxu2 %v1339_v44 }
  0x2d   :  { %633 = vmatpush.bf16.msrb.mxu3 %v1334_v8  ;;  %v1357_v8 = vld [vmem:[%s1700_s6 + $0x20] sm:$0xff] }
  0x2e   :  { %525 = vmatpush.bf16.msrb.mxu0 %v1316_v51  ;;  %v1344_v51 = vld [vmem:[%s1698_s4 + $0x18] sm:$0xff] }
  0x2f   :  { %539 = vmatpush.bf16.msrb.mxu1 %v1324_v52 }
  0x30   :  { %690 = vmatpush.bf16.msra.mxu2 %v1338_v45 }
  0x31   :  { %634 = vmatpush.bf16.msrb.mxu3 %v1333_v9  ;;  %v1356_v9 = vld [vmem:[%s1700_s6 + $0x18] sm:$0xff] }
  0x32   :  { %526 = vmatpush.bf16.msrb.mxu0 %v1315_v53 }
  0x33   :  { %540 = vmatpush.bf16.msrb.mxu1 %v1323_v56  ;;  %1142 = vmatmul.msk.bf16.vlgmr.msrb.gmra.mxu2 %vm462_vm0, %v945_v57  ;;  %v1343_v57 = vld [vmem:[%s1698_s4 + $0x10] sm:$0xff] }
  0x34   :  { %691 = vmatpush.bf16.msra.mxu2 %v1337_v46 }
  0x35   :  { %635 = vmatpush.bf16.msrb.mxu3 %v1332_v10 }
  0x36   :  { %527 = vmatpush.bf16.msrb.mxu0 %v1314_v58  ;;  %v1342_v58 = vld [vmem:[%s1698_s4 + $0x8] sm:$0xff] }
  0x37   :  { %541 = vmatpush.bf16.msrb.mxu1 %v1322_v59  ;;  %v1341_v59 = vld [vmem:[%s1698_s4] sm:$0xff] }
  0x39   :  { %636 = vmatpush.bf16.msrb.mxu3 %v1331_v11 }
  0x3a   :  { %528 = vmatpush.bf16.msrb.mxu0 %v1313_v60  ;;  %v1352_v60 = vld [vmem:[%s1699_s5 + $0x18] sm:$0xff] }
  0x3b   :  { %542 = vmatpush.bf16.msrb.mxu1 %v1321_v61 }
  0x3d   :  { %637 = vmatpush.bf16.msrb.mxu3 %v1330_v12 }
  0x3e   :  { %529 = vmatpush.bf16.msrb.mxu0 %v1312_v62 }
  0x3f   :  { %543 = vmatpush.bf16.msrb.mxu1 %v1320_v1 }
  0x41   :  { %530 = vmatmul.bf16.vlgmr.msrb.gmra.mxu0 %v937_v4  ;;  %638 = vmatpush.bf16.msrb.mxu3 %v1329_v15  ;;  %v1349_v4 = vld [vmem:[%s1699_s5] sm:$0xff]  ;;  %v1355_v15 = vld [vmem:[%s1700_s6 + $0x10] sm:$0xff] }
  0x42   :  { %544 = vmatmul.bf16.vlgmr.msrb.gmra.mxu1 %v941_v5  ;;  %765 = vmatpush.bf16.msra.mxu0 %v1348_v47  ;;  %v1360_v5 = vld [vmem:[%s1700_s6 + $0x38] sm:$0xff] }
  0x43   :  { %821 = vmatpush.bf16.msra.mxu1 %v1352_v60  ;;  %898 = vmatpush.bf16.msrb.mxu2 %v1360_v5 }
  0x46   :  { %766 = vmatpush.bf16.msra.mxu0 %v1347_v48 }
  0x47   :  { %822 = vmatpush.bf16.msra.mxu1 %v1351_v2  ;;  %899 = vmatpush.bf16.msrb.mxu2 %v1359_v6 }
  0x4a   :  { %767 = vmatpush.bf16.msra.mxu0 %v1346_v49 }
  0x4b   :  { %823 = vmatpush.bf16.msra.mxu1 %v1350_v3  ;;  %900 = vmatpush.bf16.msrb.mxu2 %v1358_v7 }
  0x4e   :  { %768 = vmatpush.bf16.msra.mxu0 %v1345_v50 }
  0x4f   :  { %824 = vmatpush.bf16.msra.mxu1 %v1349_v4  ;;  %901 = vmatpush.bf16.msrb.mxu2 %v1357_v8 }
  0x52   :  { %769 = vmatpush.bf16.msra.mxu0 %v1344_v51 }
  0x53   :  { %902 = vmatpush.bf16.msrb.mxu2 %v1356_v9 }
  0x56   :  { %770 = vmatpush.bf16.msra.mxu0 %v1343_v57 }
  0x57   :  { %903 = vmatpush.bf16.msrb.mxu2 %v1355_v15 }
  0x5a   :  { %771 = vmatpush.bf16.msra.mxu0 %v1342_v58 }
  0x5e   :  { %772 = vmatpush.bf16.msra.mxu0 %v1341_v59 }
  0x9e   :  { %v475_v13 = vpop.f32.mrf.mxu0 }
  0x9f   :  { %v489_v14 = vpop.f32.mrf.mxu1 }
  0xa0   :  { %v490_v19 = vadd.f32 %v489_v14, %v475_v13 }
  0xa6   :  { %v503_v16 = vpop.f32.mrf.mxu2  ;;  %v477_v18 = vpop.f32.mrf.mxu0 }
  0xa7   :  { %v491_v20 = vpop.f32.mrf.mxu1  ;;  %v517_v21 = vpop.f32.mrf.mxu3  ;;  %v504_v23 = vadd.f32 %v503_v16, %v490_v19  ;;  %v1354_v16 = vld [vmem:[%s1700_s6 + $0x8] sm:$0xff] }
  0xa8   :  { %v492_v24 = vadd.f32 %v491_v20, %v477_v18  ;;  %904 = vmatpush.bf16.msrb.mxu2 %v1354_v16 }
  0xa9   :  { %v518_v26 = vadd.f32 %v517_v21, %v504_v23 }
  0xac   :  { %905 = vmatpush.bf16.msrb.mxu2 %v1353_v17 }
  0xae   :  { %v505_v22 = vpop.f32.mrf.mxu2 }
  0xaf   :  { %v506_v29 = vadd.f32 %v505_v22, %v492_v24  ;;  %v519_v31 = vpop.f32.mrf.mxu3 }
  0xb1   :  { %v520_v32 = vadd.f32 %v519_v31, %v506_v29 }
  0xb6   :  { %v559_v28 = vpop.f32.mrf.mxu2 }
  0xbe   :  { %v531_v25 = vpop.f32.mrf.mxu0  ;;  %v561_v39 = vpop.f32.mrf.mxu2 }
  0xbf   :  { %v545_v27 = vpop.f32.mrf.mxu1  ;;  %v532_v30 = vadd.f32 %v531_v25, %v518_v26 }
  0xc1   :  { %v546_v33 = vadd.f32 %v545_v27, %v532_v30 }
  0xc3   :  { %v560_v37 = vadd.f32 %v559_v28, %v546_v33 }
  0xc5   :  { %v564_v41 = vmax.f32 %v560_v37, 0.0 }
  0xc6   :  { %v533_v34 = vpop.f32.mrf.mxu0 }
  0xc7   :  { %v534_v35 = vadd.f32 %v533_v34, %v520_v32  ;;  %v547_v36 = vpop.f32.mrf.mxu1 }
  0xc9   :  { %v548_v38 = vadd.f32 %v547_v36, %v534_v35 }
  0xcb   :  { %v562_v40 = vadd.f32 %v561_v39, %v548_v38 }
  0xcd   :  { %v565_v42 = vmax.f32 %v562_v40, 0.0 }
  0xcf   :  { %v566_v43 = vpack.c.bf16 %v565_v42, %v564_v41 }
  0xd1   :  { %639 = vmatmul.bf16.vlgmr.msrb.gmra.mxu3 %v566_v43 }
 0x154   :  { %v640_v52 = vpop.f32.mrf.mxu3 }
 0x155   :  { %v645_v54 = vmax.f32 %v640_v52, 0.0 }
 0x15c   :  { %v642_v53 = vpop.f32.mrf.mxu3 }
 0x15d   :  { %v646_v55 = vmax.f32 %v642_v53, 0.0 }
 0x15f   :  { %v647_v56 = vpack.c.bf16 %v646_v55, %v645_v54 }
 0x161   :  { %1191 = vmatmul.msk.bf16.vlgmr.msra.gmra.mxu2 %vm680_vm1, %v647_v56 }
 0x1e4   :  { %v693_v61 = vpop.f32.mrf.mxu2 }
 0x1e5   :  { %v698_v63 = vmax.f32 %v693_v61, 0.0 }
 0x1ec   :  { %v695_v62 = vpop.f32.mrf.mxu2 }
 0x1ed   :  { %v699_v0 = vmax.f32 %v695_v62, 0.0 }
 0x1ef   :  { %v700_v1 = vpack.c.bf16 %v699_v0, %v698_v63 }
 0x1f1   :  { %773 = vmatmul.bf16.vlgmr.msra.gmra.mxu0 %v700_v1 }
 0x26e   :  { %v774_v10 = vpop.f32.mrf.mxu0 }
 0x26f   :  { %v779_v12 = vmax.f32 %v774_v10, 0.0 }
 0x276   :  { %v776_v11 = vpop.f32.mrf.mxu0 }
 0x277   :  { %v780_v13 = vmax.f32 %v776_v11, 0.0 }
 0x279   :  { %v781_v14 = vpack.c.bf16 %v780_v13, %v779_v12 }
 0x27b   :  { %1240 = vmatmul.msk.bf16.vlgmr.msra.gmra.mxu1 %vm680_vm1, %v781_v14 }
 0x2f8   :  { %v826_v18 = vpop.f32.mrf.mxu1 }
 0x2f9   :  { %v831_v20 = vmax.f32 %v826_v18, 0.0 }
 0x300   :  { %v828_v19 = vpop.f32.mrf.mxu1 }
 0x301   :  { %v832_v21 = vmax.f32 %v828_v19, 0.0 }
 0x303   :  { %v833_v22 = vpack.c.bf16 %v832_v21, %v831_v20 }
 0x305   :  { %906 = vmatmul.bf16.vlgmr.msrb.gmra.mxu2 %v833_v22 }
 0x388   :  { %v907_v23 = vpop.f32.mrf.mxu2 }
 0x389   :  { %912 = vst [vmem:[%s1701_s7] sm:$0xff] %v907_v23 }
 0x390   :  { %v909_v24 = vpop.f32.mrf.mxu2 }
 0x391   :  { %913 = vst [vmem:[%s1701_s7 + $0x8] sm:$0xff] %v909_v24 }

</bundles_post_ra>
